<compile_context>
chip_gen: v5e
topology: v5e:2x2
jax: 0.10.0
libtpu: 0.0.40
codegen_flags: <defaults>
</compile_context>

<pallas_src>
import math

import jax
import jax.numpy as jnp
from jax.experimental import pallas as pl
from jax.experimental.pallas import tpu as pltpu


def _round_up(x, m):
    return (x + m - 1) // m * m


def mlp_kernel_fused(x_ref, w1_ref, b1_ref, w2_ref, b2_ref, o_ref):
    """Single-step fused: relu(x @ W1 + b1) @ W2 + b2 (whole d_mlp resident)."""
    h = jnp.dot(x_ref[...], w1_ref[...], preferred_element_type=jnp.float32)
    h = jnp.maximum(h + b1_ref[...], 0.0)
    out = jnp.dot(h.astype(w2_ref.dtype), w2_ref[...],
                  preferred_element_type=jnp.float32)
    o_ref[...] = (out + b2_ref[...]).astype(o_ref.dtype)


def mlp_kernel_chunked(x_ref, w1_ref, b1_ref, w2_ref, b2_ref, o_ref, acc_ref):
    """One (batch-tile, d_mlp-chunk) step of: relu(x @ W1 + b1) @ W2 + b2."""
    k = pl.program_id(1)

    @pl.when(k == 0)
    def _init():
        acc_ref[...] = jnp.zeros_like(acc_ref)

    # Hidden chunk (TILE_B, TILE_K); MXU accumulates in f32.
    h = jnp.dot(x_ref[...], w1_ref[...], preferred_element_type=jnp.float32)
    h = jnp.maximum(h + b1_ref[...], 0.0)

    # Second matmul accumulated into the resident f32 scratch (b2 added once
    # at the end, not per chunk).
    acc_ref[...] += jnp.dot(h.astype(w2_ref.dtype), w2_ref[...],
                            preferred_element_type=jnp.float32)

    @pl.when(k == pl.num_programs(1) - 1)
    def _finalize():
        o_ref[...] = (acc_ref[...] + b2_ref[...]).astype(o_ref.dtype)


def mlp_forward(x, w1, b1, w2, b2, *, tile_b=None, tile_k=None):
    """Fused MLP forward: relu(x @ W1 + b1) @ W2 + b2.

    x:  (B, d_resid)
    w1: (d_resid, d_mlp)   (transpose of torch Linear.weight)
    b1: (d_mlp,) or (1, d_mlp)
    w2: (d_mlp, d_resid)
    b2: (d_resid,) or (1, d_resid)
    """
    B, d_resid = x.shape
    d_mlp = w1.shape[1]
    b1 = b1.reshape(1, d_mlp)
    b2 = b2.reshape(1, d_resid)

    # ---- Tile / padding plan: lane-dense last dims, sublane-aligned batch tile.
    dr_p = _round_up(d_resid, 128)

    if tile_b is None:
        tile_b = 256 if B >= 256 else (128 if B >= 128 else _round_up(B, 8))
    tile_b = _round_up(tile_b, 8)
    B_p = _round_up(B, tile_b)

    dm_p = _round_up(d_mlp, 128)
    if tile_k is None:
        # Keep weights fully VMEM-resident when small; otherwise stream d_mlp
        # chunks and accumulate the second matmul in the f32 scratch.
        w_bytes = dr_p * dm_p * (w1.dtype.itemsize + w2.dtype.itemsize)
        tile_k = dm_p if w_bytes <= 8 * 1024 * 1024 else 512
    tile_k = min(_round_up(tile_k, 128), dm_p)
    dm_p = _round_up(dm_p, tile_k)

    nb = B_p // tile_b
    nk = dm_p // tile_k

    # Zero padding keeps the math exact: padded x rows are sliced off, padded
    # columns/rows of W1/W2/b1/b2 contribute 0 (relu(0) = 0).
    xp = jnp.pad(x, ((0, B_p - B), (0, dr_p - d_resid)))
    w1p = jnp.pad(w1, ((0, dr_p - d_resid), (0, dm_p - d_mlp)))
    b1p = jnp.pad(b1, ((0, 0), (0, dm_p - d_mlp)))
    w2p = jnp.pad(w2, ((0, dm_p - d_mlp), (0, dr_p - d_resid)))
    b2p = jnp.pad(b2, ((0, 0), (0, dr_p - d_resid)))

    out_dtype = x.dtype

    # ---- VMEM budget (double-buffered tiles + resident scratch) with headroom.
    f32 = 4
    vmem_est = (2 * tile_b * dr_p * xp.dtype.itemsize                 # x tiles
                + 2 * tile_b * dr_p * jnp.dtype(out_dtype).itemsize   # out tiles
                + 2 * dr_p * tile_k * w1p.dtype.itemsize              # W1 tiles
                + 2 * tile_k * dr_p * w2p.dtype.itemsize              # W2 tiles
                + 2 * tile_k * b1p.dtype.itemsize                     # b1 tiles
                + 2 * dr_p * b2p.dtype.itemsize                       # b2 tiles
                + tile_b * dr_p * f32                                 # f32 accumulator
                + tile_b * tile_k * f32)                              # hidden chunk
    # Safe on every generation: <= 48 MiB stays under v7x's 64 MiB physical VMEM.
    vmem_limit = int(min(max(2 * vmem_est, 32 * 1024 * 1024), 48 * 1024 * 1024))

    cost = pl.CostEstimate(
        flops=2 * 2 * B_p * dr_p * dm_p,
        transcendentals=0,
        bytes_accessed=(xp.size * xp.dtype.itemsize
                        + w1p.size * w1p.dtype.itemsize
                        + w2p.size * w2p.dtype.itemsize
                        + b1p.size * b1p.dtype.itemsize
                        + b2p.size * b2p.dtype.itemsize
                        + B_p * dr_p * jnp.dtype(out_dtype).itemsize),
    )

    if nk == 1:
        # Fast path: whole d_mlp fits in one chunk -> no accumulator scratch,
        # weights stay VMEM-resident across the batch grid (index_map -> 0).
        grid_spec = pltpu.PrefetchScalarGridSpec(
            num_scalar_prefetch=0,
            grid=(nb,),
            in_specs=[
                pl.BlockSpec((tile_b, dr_p), lambda i: (i, 0)),   # x
                pl.BlockSpec((dr_p, dm_p), lambda i: (0, 0)),     # W1
                pl.BlockSpec((1, dm_p), lambda i: (0, 0)),        # b1
                pl.BlockSpec((dm_p, dr_p), lambda i: (0, 0)),     # W2
                pl.BlockSpec((1, dr_p), lambda i: (0, 0)),        # b2
            ],
            out_specs=pl.BlockSpec((tile_b, dr_p), lambda i: (i, 0)),
        )
        kernel = mlp_kernel_fused
        dim_sem = ("parallel",)
    else:
        grid_spec = pltpu.PrefetchScalarGridSpec(
            num_scalar_prefetch=0,
            grid=(nb, nk),
            in_specs=[
                pl.BlockSpec((tile_b, dr_p), lambda i, k: (i, 0)),   # x
                pl.BlockSpec((dr_p, tile_k), lambda i, k: (0, k)),   # W1
                pl.BlockSpec((1, tile_k), lambda i, k: (0, k)),      # b1
                pl.BlockSpec((tile_k, dr_p), lambda i, k: (k, 0)),   # W2
                pl.BlockSpec((1, dr_p), lambda i, k: (0, 0)),        # b2
            ],
            out_specs=pl.BlockSpec((tile_b, dr_p), lambda i, k: (i, 0)),
            scratch_shapes=[pltpu.VMEM((tile_b, dr_p), jnp.float32)],
        )
        kernel = mlp_kernel_chunked
        dim_sem = ("parallel", "arbitrary")

    out_p = pl.pallas_call(
        kernel,
        out_shape=jax.ShapeDtypeStruct((B_p, dr_p), out_dtype),
        grid_spec=grid_spec,
        compiler_params=pltpu.CompilerParams(
            dimension_semantics=dim_sem,
            vmem_limit_bytes=vmem_limit,
        ),
        cost_estimate=cost,
    )(xp, w1p, b1p, w2p, b2p)

    return out_p[:B, :d_resid]


def xavier_uniform(key, fan_in, fan_out, shape, dtype=jnp.float32):
    # Matches torch.nn.init.xavier_uniform_ (gain=1).
    bound = math.sqrt(6.0 / (fan_in + fan_out))
    return jax.random.uniform(key, shape, dtype, minval=-bound, maxval=bound)


if __name__ == "__main__":
    key = jax.random.PRNGKey(0)

    # --- Test 1: small shapes matching the module (resident-weight path, nk=1).
    d_resid, d_mlp, batch = 32, 128, 8
    kx, k1, k2, key = jax.random.split(key, 4)
    # torch Linear l1 weight is (d_mlp, d_resid); we store its transpose.
    w1 = xavier_uniform(k1, d_resid, d_mlp, (d_resid, d_mlp))
    w2 = xavier_uniform(k2, d_mlp, d_resid, (d_mlp, d_resid))
    b1 = jnp.zeros((1, d_mlp), jnp.float32)
    b2 = jnp.zeros((1, d_resid), jnp.float32)
    x = jax.random.normal(kx, (batch, d_resid), jnp.float32)

    out = mlp_forward(x, w1, b1, w2, b2)
    jax.block_until_ready(out)
    ref = jnp.maximum(x @ w1 + b1, 0.0) @ w2 + b2
    assert out.shape == (batch, d_resid)
    assert jnp.allclose(out, ref, atol=1e-5, rtol=1e-5)

    # --- Test 2: exercise the chunked d_mlp accumulation path (nk > 1).
    d_resid2, d_mlp2, batch2 = 64, 256, 24
    kx2, k1b, k2b, kb1 = jax.random.split(key, 4)
    w1b = xavier_uniform(k1b, d_resid2, d_mlp2, (d_resid2, d_mlp2))
    w2b = xavier_uniform(k2b, d_mlp2, d_resid2, (d_mlp2, d_resid2))
    b1b = 0.1 * jax.random.normal(kb1, (1, d_mlp2), jnp.float32)
    b2b = jnp.zeros((1, d_resid2), jnp.float32)
    xb = jax.random.normal(kx2, (batch2, d_resid2), jnp.float32)

    out2 = mlp_forward(xb, w1b, b1b, w2b, b2b, tile_k=128)
    jax.block_until_ready(out2)
    ref2 = jnp.maximum(xb @ w1b + b1b, 0.0) @ w2b + b2b
    assert out2.shape == (batch2, d_resid2)
    assert jnp.allclose(out2, ref2, atol=1e-4, rtol=1e-4)

    print("KERNEL_OK")
</pallas_src>

<mosaic_0001>
module attributes {stable_mosaic.version = 11 : i64} {
  func.func @mlp_kernel_fused(%arg0: i32, %arg1: memref<8x128xf32, #tpu.memory_space<vmem>>, %arg2: memref<128x128xf32, #tpu.memory_space<vmem>>, %arg3: memref<1x128xf32, #tpu.memory_space<vmem>>, %arg4: memref<128x128xf32, #tpu.memory_space<vmem>>, %arg5: memref<1x128xf32, #tpu.memory_space<vmem>>, %arg6: memref<8x128xf32, #tpu.memory_space<vmem>>) attributes {dimension_semantics = [#tpu.dimension_semantics<parallel>], iteration_bounds = array<i64: 1>, scalar_prefetch = 0 : i64, scratch_operands = 0 : i64, tpu.core_type = #tpu.core_type<tc>, window_params = [{transform_indices = @transform_0, window_bounds = array<i64: 8, 128>}, {pipeline_mode = #tpu.pipeline_mode<synchronous>, transform_indices = @transform_1, window_bounds = array<i64: 128, 128>}, {pipeline_mode = #tpu.pipeline_mode<synchronous>, transform_indices = @transform_2, window_bounds = array<i64: 1, 128>}, {pipeline_mode = #tpu.pipeline_mode<synchronous>, transform_indices = @transform_3, window_bounds = array<i64: 128, 128>}, {pipeline_mode = #tpu.pipeline_mode<synchronous>, transform_indices = @transform_4, window_bounds = array<i64: 1, 128>}, {transform_indices = @transform_5, window_bounds = array<i64: 8, 128>}]} {
    %c0 = arith.constant 0 : index
    %c0_0 = arith.constant 0 : index
    %0 = vector.load %arg1[%c0, %c0_0] : memref<8x128xf32, #tpu.memory_space<vmem>>, vector<8x128xf32>
    %c0_1 = arith.constant 0 : index
    %c0_2 = arith.constant 0 : index
    %1 = vector.load %arg2[%c0_1, %c0_2] : memref<128x128xf32, #tpu.memory_space<vmem>>, vector<128x128xf32>
    %cst = arith.constant dense<0.000000e+00> : vector<8x128xf32>
    %2 = tpu.matmul %0, %1, %cst {dimension_numbers = #tpu.dot_dimension_numbers<[1], [0], [0], [1], [0, 0, 1, 1], [], []>} : vector<8x128xf32>, vector<128x128xf32>, vector<8x128xf32> -> vector<8x128xf32>
    %c0_3 = arith.constant 0 : index
    %c0_4 = arith.constant 0 : index
    %3 = vector.load %arg3[%c0_3, %c0_4] : memref<1x128xf32, #tpu.memory_space<vmem>>, vector<1x128xf32>
    %4 = vector.broadcast %3 : vector<1x128xf32> to vector<8x128xf32>
    %5 = arith.addf %2, %4 : vector<8x128xf32>
    %cst_5 = arith.constant 0.000000e+00 : f32
    %6 = vector.broadcast %cst_5 : f32 to vector<8x128xf32>
    %7 = arith.maximumf %5, %6 : vector<8x128xf32>
    %c0_6 = arith.constant 0 : index
    %c0_7 = arith.constant 0 : index
    %8 = vector.load %arg4[%c0_6, %c0_7] : memref<128x128xf32, #tpu.memory_space<vmem>>, vector<128x128xf32>
    %cst_8 = arith.constant dense<0.000000e+00> : vector<8x128xf32>
    %9 = tpu.matmul %7, %8, %cst_8 {dimension_numbers = #tpu.dot_dimension_numbers<[1], [0], [0], [1], [0, 0, 1, 1], [], []>} : vector<8x128xf32>, vector<128x128xf32>, vector<8x128xf32> -> vector<8x128xf32>
    %c0_9 = arith.constant 0 : index
    %c0_10 = arith.constant 0 : index
    %10 = vector.load %arg5[%c0_9, %c0_10] : memref<1x128xf32, #tpu.memory_space<vmem>>, vector<1x128xf32>
    %11 = vector.broadcast %10 : vector<1x128xf32> to vector<8x128xf32>
    %12 = arith.addf %9, %11 : vector<8x128xf32>
    %c0_11 = arith.constant 0 : index
    %c0_12 = arith.constant 0 : index
    %13 = vector.load %arg6[%c0_11, %c0_12] : memref<8x128xf32, #tpu.memory_space<vmem>>, vector<8x128xf32>
    tpu.vector_store %arg6[%c0_11, %c0_12], %12 {strides = array<i32>} : memref<8x128xf32, #tpu.memory_space<vmem>>, vector<8x128xf32>,
    return
  }
  func.func @transform_0(%arg0: i32) -> (i32, i32) {
    %c0_i32 = arith.constant 0 : i32
    %c0_i32_0 = arith.constant 0 : i32
    return %arg0, %c0_i32 : i32, i32
  }
  func.func @transform_1(%arg0: i32) -> (i32, i32) {
    %c0_i32 = arith.constant 0 : i32
    %c0_i32_0 = arith.constant 0 : i32
    %c0_i32_1 = arith.constant 0 : i32
    return %c0_i32, %c0_i32_0 : i32, i32
  }
  func.func @transform_2(%arg0: i32) -> (i32, i32) {
    %c0_i32 = arith.constant 0 : i32
    %c0_i32_0 = arith.constant 0 : i32
    %c0_i32_1 = arith.constant 0 : i32
    return %c0_i32, %c0_i32_0 : i32, i32
  }
  func.func @transform_3(%arg0: i32) -> (i32, i32) {
    %c0_i32 = arith.constant 0 : i32
    %c0_i32_0 = arith.constant 0 : i32
    %c0_i32_1 = arith.constant 0 : i32
    return %c0_i32, %c0_i32_0 : i32, i32
  }
  func.func @transform_4(%arg0: i32) -> (i32, i32) {
    %c0_i32 = arith.constant 0 : i32
    %c0_i32_0 = arith.constant 0 : i32
    %c0_i32_1 = arith.constant 0 : i32
    return %c0_i32, %c0_i32_0 : i32, i32
  }
  func.func @transform_5(%arg0: i32) -> (i32, i32) {
    %c0_i32 = arith.constant 0 : i32
    %c0_i32_0 = arith.constant 0 : i32
    return %arg0, %c0_i32 : i32, i32
  }
}

</mosaic_0001>

<bundles_post_ra>
// kernel: tpu_custom_call.1
= control target key start
LH: loop header
LB: loop body
LE: loop exit
PB: predicated region body
PF: predicated region fallthrough
CT: control target
= control target key end

     0   :  { %10 = vsyncpa [#allocation3], 0  ;;  %s331_s0 = inlined_call_operand.hbm [shape: f32[8,128], index: 0, kind: input, shape index: {}]   ;;  %s332_s1 = inlined_call_operand.hbm [shape: f32[128,128], index: 1, kind: input, shape index: {}]   ;;  %s333_s2 = inlined_call_operand.vmem [shape: f32[1,128], index: 2, kind: input, shape index: {}]   ;;  %s334_s3 = inlined_call_operand.hbm [shape: f32[128,128], index: 3, kind: input, shape index: {}]   ;;  %s335_s4 = inlined_call_operand.vmem [shape: f32[1,128], index: 4, kind: input, shape index: {}]   ;;  %s336_s5 = inlined_call_operand.hbm [shape: f32[8,128], index: 5, kind: output, shape index: {}]  }
   0x1   :  { %11 = vsyncpa [#allocation6], 0  ;;  %s28_s20 = sshll.u32 %s332_s1, 4  ;;  %s29_s20 = int_to_ptr.hbm [resolvable:$true] %s28_s20 }
   0x2   :  { %12 = vsyncpa [#allocation4], 0  ;;  %s277_s21 = smov [#allocation5]   ;;  %s18_s25 = sshll.u32 %s331_s0, 4  ;;  %s19_s25 = int_to_ptr.hbm [resolvable:$true] %s18_s25 }
   0x3   :  { %s30_s22 = sshll.u32 %s277_s21, 4  ;;  %s278_s26 = smov 128   ;;  %s31_s22 = int_to_ptr.vmem [resolvable:$true] %s30_s22 }
   0x4   :  { %s279_s27 = smov 8   ;;  %s280_s28 = smov [#allocation2]  }
   0x5   :  { %36 = dma.hbm_to_vmem [thread:$0]  %s29_s20, 2048, %s31_s22, [#allocation6], %s278_s26, %s278_s26, %s279_s27  }
   0x6   :  { %s20_s29 = sshll.u32 %s280_s28, 4  ;;  %s43_s7 = sshll.u32 %s334_s3, 4  ;;  %s21_s29 = int_to_ptr.vmem [resolvable:$true] %s20_s29  ;;  %s44_s7 = int_to_ptr.hbm [resolvable:$true] %s43_s7 }
   0x7   :  { %23 = dma.hbm_to_vmem [thread:$0]  %s19_s25, 128, %s21_s29, [#allocation3]  }
   0x8   :  { %s281_s1 = smov [#allocation7]  }
   0x9   :  { %s45_s8 = sshll.u32 %s281_s1, 4  ;;  %s46_s8 = int_to_ptr.vmem [resolvable:$true] %s45_s8 }
   0xa   :  { %51 = dma.hbm_to_vmem [thread:$0]  %s44_s7, 2048, %s46_s8, [#allocation6], %s278_s26, %s278_s26, %s279_s27  }
   0xb   :  { %271 = dma.done.wait [#allocation3], 128  }
   0xc   :  { %272 = vsyncadd [#allocation3], 4294967168 }
   0xd   :  { %273 = dma.done.wait [#allocation6], 4096  }
   0xe   :  { %274 = vsyncadd [#allocation6], 4294963200  ;;  %v82_v0 = vld [vmem:[#allocation5 + $0x78] sm:$0xff]  ;;  %v81_v1 = vld [vmem:[#allocation5 + $0x70] sm:$0xff]  ;;  %s282_s11 = smov [#allocation8]   ;;  %s156_s15 = sshll.u32 %s336_s5, 4  ;;  %s157_s15 = int_to_ptr.hbm [resolvable:$true] %s156_s15 }
   0xf   :  { %87 = vmatpush.msra.mxu0 %v82_v0  ;;  %v80_v2 = vld [vmem:[#allocation5 + $0x68] sm:$0xff]  ;;  %v79_v3 = vld [vmem:[#allocation5 + $0x60] sm:$0xff]  ;;  %v123_v4 = vld [vmem:[#allocation7 + $0x78] sm:$0xff]  ;;  %s154_s12 = sshll.u32 %s282_s11, 4  ;;  %s155_s12 = int_to_ptr.vmem [resolvable:$true] %s154_s12 }
  0x10   :  { %v78_v5 = vld [vmem:[#allocation5 + $0x58] sm:$0xff]  ;;  %128 = vmatpush.msra.mxu1 %v123_v4  ;;  %v122_v6 = vld [vmem:[#allocation7 + $0x70] sm:$0xff]  ;;  %v121_v7 = vld [vmem:[#allocation7 + $0x68] sm:$0xff] }
  0x11   :  { %88 = vmatpush.msra.mxu0 %v81_v1  ;;  %v77_v8 = vld [vmem:[#allocation5 + $0x50] sm:$0xff]  ;;  %v120_v9 = vld [vmem:[#allocation7 + $0x60] sm:$0xff]  ;;  %v76_v10 = vld [vmem:[#allocation5 + $0x48] sm:$0xff] }
  0x12   :  { %129 = vmatpush.msra.mxu1 %v122_v6  ;;  %v119_v11 = vld [vmem:[#allocation7 + $0x58] sm:$0xff]  ;;  %v75_v12 = vld [vmem:[#allocation5 + $0x40] sm:$0xff]  ;;  %v118_v13 = vld [vmem:[#allocation7 + $0x50] sm:$0xff] }
  0x13   :  { %89 = vmatpush.msra.mxu0 %v80_v2  ;;  %v74_v14 = vld [vmem:[#allocation5 + $0x38] sm:$0xff]  ;;  %v117_v15 = vld [vmem:[#allocation7 + $0x48] sm:$0xff]  ;;  %v73_v16 = vld [vmem:[#allocation5 + $0x30] sm:$0xff] }
  0x14   :  { %130 = vmatpush.msra.mxu1 %v121_v7  ;;  %v116_v17 = vld [vmem:[#allocation7 + $0x40] sm:$0xff]  ;;  %v72_v18 = vld [vmem:[#allocation5 + $0x28] sm:$0xff]  ;;  %v115_v19 = vld [vmem:[#allocation7 + $0x38] sm:$0xff] }
  0x15   :  { %90 = vmatpush.msra.mxu0 %v79_v3  ;;  %v71_v20 = vld [vmem:[#allocation5 + $0x20] sm:$0xff]  ;;  %v114_v21 = vld [vmem:[#allocation7 + $0x30] sm:$0xff]  ;;  %v70_v22 = vld [vmem:[#allocation5 + $0x18] sm:$0xff] }
  0x16   :  { %131 = vmatpush.msra.mxu1 %v120_v9  ;;  %v113_v23 = vld [vmem:[#allocation7 + $0x28] sm:$0xff]  ;;  %v69_v24 = vld [vmem:[#allocation5 + $0x10] sm:$0xff]  ;;  %v112_v25 = vld [vmem:[#allocation7 + $0x20] sm:$0xff] }
  0x17   :  { %91 = vmatpush.msra.mxu0 %v78_v5  ;;  %v68_v26 = vld [vmem:[#allocation5 + $0x8] sm:$0xff]  ;;  %v111_v27 = vld [vmem:[#allocation7 + $0x18] sm:$0xff]  ;;  %v67_v28 = vld [vmem:[#allocation5] sm:$0xff] }
  0x18   :  { %132 = vmatpush.msra.mxu1 %v119_v11  ;;  %v66_v29 = vld [vmem:[#allocation2] sm:$0xff]  ;;  %v110_v30 = vld [vmem:[#allocation7 + $0x10] sm:$0xff]  ;;  %v109_v31 = vld [vmem:[#allocation7 + $0x8] sm:$0xff] }
  0x19   :  { %92 = vmatpush.msra.mxu0 %v77_v8  ;;  %v108_v32 = vld [vmem:[#allocation7] sm:$0xff]  ;;  %v173_v33 = vld [vmem:[%s333_s2] ss:$0 sm:$0xff] }
  0x1a   :  { %133 = vmatpush.msra.mxu1 %v118_v13  ;;  %v174_v37 = vld [vmem:[%s335_s4] ss:$0 sm:$0xff] }
  0x1b   :  { %93 = vmatpush.msra.mxu0 %v76_v10 }
  0x1c   :  { %134 = vmatpush.msra.mxu1 %v117_v15 }
  0x1d   :  { %94 = vmatpush.msra.mxu0 %v75_v12 }
  0x1e   :  { %135 = vmatpush.msra.mxu1 %v116_v17 }
  0x1f   :  { %95 = vmatpush.msra.mxu0 %v74_v14 }
  0x20   :  { %136 = vmatpush.msra.mxu1 %v115_v19 }
  0x21   :  { %96 = vmatpush.msra.mxu0 %v73_v16 }
  0x22   :  { %137 = vmatpush.msra.mxu1 %v114_v21 }
  0x23   :  { %97 = vmatpush.msra.mxu0 %v72_v18 }
  0x24   :  { %138 = vmatpush.msra.mxu1 %v113_v23 }
  0x25   :  { %98 = vmatpush.msra.mxu0 %v71_v20 }
  0x26   :  { %139 = vmatpush.msra.mxu1 %v112_v25 }
  0x27   :  { %99 = vmatpush.msra.mxu0 %v70_v22 }
  0x28   :  { %140 = vmatpush.msra.mxu1 %v111_v27 }
  0x29   :  { %100 = vmatpush.msra.mxu0 %v69_v24 }
  0x2a   :  { %141 = vmatpush.msra.mxu1 %v110_v30 }
  0x2b   :  { %101 = vmatpush.msra.mxu0 %v68_v26 }
  0x2c   :  { %142 = vmatpush.msra.mxu1 %v109_v31 }
  0x2d   :  { %102 = vmatpush.msra.mxu0 %v67_v28 }
  0x2e   :  { %103 = vmatmul.f32.vlgmr.msra.gmra.mxu0 %v66_v29  ;;  %143 = vmatpush.msra.mxu1 %v108_v32 }
  0xab   :  { %v104_v34 = vpop.f32.mrf.mxu0 }
  0xac   :  { %v105_v35 = vadd.f32 %v173_v33, %v104_v34 }
  0xae   :  { %v107_v36 = vmax.f32 %v105_v35, 0.0 }
  0xb0   :  { %144 = vmatmul.f32.vlgmr.msra.gmra.mxu1 %v107_v36 }
 0x12d   :  { %v145_v38 = vpop.f32.mrf.mxu1 }
 0x12e   :  { %v146_v39 = vadd.f32 %v174_v37, %v145_v38 }
 0x130   :  { %148 = vst [vmem:[#allocation8] sm:$0xff] %v146_v39 }
 0x131   :  { %159 = dma.vmem_to_hbm [thread:$0]  %s155_s12, 128, %s157_s15, [#allocation4]  }
 0x132   :  { %275 = dma.done.wait [#allocation4], 128  }
 0x133   :  { %276 = vsyncadd [#allocation4], 4294967168 }
 0x134   :  { %164 = vsyncpa [#allocation3], 1 }
 0x135   :  { %165 = vsyncpa [#allocation6], 1 }
 0x136   :  { %166 = vsyncpa [#allocation4], 1 }

</bundles_post_ra>
